<compile_context>
chip_gen: v7x
topology: tpu7x:2x2x1
jax: 0.10.0
libtpu: 0.0.40
codegen_flags: <defaults>
</compile_context>

<pallas_src>
import math
import jax
import jax.numpy as jnp
from jax.experimental import pallas as pl
from jax.experimental.pallas import tpu as pltpu

# ---- problem sizes (small, consistent with the module's (B, SQ, D)/(B, SK, D)) ----
B, SQ, SK, D = 2, 256, 32, 32
INV_SCALE = math.sqrt(D)      # self.inv_scale_factor (undefined in module)
DROP_P = 0.5                  # F.dropout defaults: p=0.5, training=True
KEEP_P = 1.0 - DROP_P

# approx reciprocal only has a Mosaic (TPU) lowering; use exact divide elsewhere
_ON_TPU = jax.default_backend() == "tpu"


def sdpa_dropout_kernel(q_ref, k_ref, v_ref, m_ref, o_ref):
    """One batch of: softmax((q @ k^T)/scale) -> dropout -> @ v, in a single step."""
    q = q_ref[0]          # (SQ, D) f32
    k = k_ref[0]          # (SK, D) f32
    v = v_ref[0]          # (SK, D) f32
    drop = m_ref[0]       # (SQ, SK) f32 pre-scaled dropout mask: 0.0 or 1/(1-p)

    # qk = x1 @ x2^T : contract last dims directly (no XLU transpose before MXU)
    s = jax.lax.dot_general(
        q, k, (((1,), (1,)), ((), ())), preferred_element_type=jnp.float32
    )
    # scaled_qk = qk / inv_scale_factor (constant folded into a multiply)
    s = s * (1.0 / INV_SCALE)

    # softmax over last dim
    s = s - jnp.max(s, axis=-1, keepdims=True)
    e = jnp.exp(s)
    denom = jnp.sum(e, axis=-1, keepdims=True)
    if _ON_TPU:
        inv = pl.reciprocal(denom, approx=True)   # EUP slot; frees VALU
    else:
        inv = 1.0 / denom                         # interpret/CPU-safe path

    # dropout(p=0.5): mask already carries the 1/(1-p) rescale (0 where dropped)
    p = e * inv * drop

    # output = dropout_qk @ value
    o_ref[0] = jnp.dot(p, v, preferred_element_type=jnp.float32)


def sdpa_dropout(x1, x2, value, drop_mask):
    Bq, Sq, Dd = x1.shape
    Sk = x2.shape[1]
    return pl.pallas_call(
        sdpa_dropout_kernel,
        out_shape=jax.ShapeDtypeStruct((Bq, Sq, Dd), jnp.float32),
        grid=(Bq,),
        in_specs=[
            pl.BlockSpec((1, Sq, Dd), lambda b: (b, 0, 0)),   # x1: full query slab
            pl.BlockSpec((1, Sk, Dd), lambda b: (b, 0, 0)),   # x2: full keys
            pl.BlockSpec((1, Sk, Dd), lambda b: (b, 0, 0)),   # value: full
            pl.BlockSpec((1, Sq, Sk), lambda b: (b, 0, 0)),   # dropout mask
        ],
        out_specs=pl.BlockSpec((1, Sq, Dd), lambda b: (b, 0, 0)),
        compiler_params=pltpu.CompilerParams(
            dimension_semantics=("parallel",),   # one batch per TC on v7x megacore
        ),
    )(x1, x2, value, drop_mask)


if __name__ == "__main__":
    key = jax.random.PRNGKey(0)
    k1, k2, k3, k4 = jax.random.split(key, 4)
    x1 = jax.random.normal(k1, (B, SQ, D), dtype=jnp.float32)
    x2 = jax.random.normal(k2, (B, SK, D), dtype=jnp.float32)
    value = jax.random.normal(k3, (B, SK, D), dtype=jnp.float32)   # deterministic `value`
    keep = jax.random.bernoulli(k4, p=KEEP_P, shape=(B, SQ, SK))
    drop_mask = keep.astype(jnp.float32) * jnp.float32(1.0 / KEEP_P)

    out = sdpa_dropout(x1, x2, value, drop_mask)
    jax.block_until_ready(out)
    assert out.shape == (B, SQ, D)
    print("KERNEL_OK")
</pallas_src>

<mosaic_0001>
module attributes {stable_mosaic.version = 11 : i64} {
  func.func @sdpa_dropout_kernel(%arg0: i32, %arg1: memref<1x256x32xf32, #tpu.memory_space<vmem>>, %arg2: memref<1x32x32xf32, #tpu.memory_space<vmem>>, %arg3: memref<1x32x32xf32, #tpu.memory_space<vmem>>, %arg4: memref<1x256x32xf32, #tpu.memory_space<vmem>>, %arg5: memref<1x256x32xf32, #tpu.memory_space<vmem>>) attributes {dimension_semantics = [#tpu.dimension_semantics<parallel>], iteration_bounds = array<i64: 2>, scalar_prefetch = 0 : i64, scratch_operands = 0 : i64, tpu.core_type = #tpu.core_type<tc>, window_params = [{transform_indices = @transform_0, window_bounds = array<i64: 1, 256, 32>}, {transform_indices = @transform_1, window_bounds = array<i64: 1, 32, 32>}, {transform_indices = @transform_2, window_bounds = array<i64: 1, 32, 32>}, {transform_indices = @transform_3, window_bounds = array<i64: 1, 256, 32>}, {transform_indices = @transform_4, window_bounds = array<i64: 1, 256, 32>}]} {
    %c0 = arith.constant 0 : index
    %c0_0 = arith.constant 0 : index
    %c0_1 = arith.constant 0 : index
    %0 = vector.load %arg1[%c0, %c0_0, %c0_1] : memref<1x256x32xf32, #tpu.memory_space<vmem>>, vector<1x256x32xf32>
    %1 = vector.shape_cast %0 : vector<1x256x32xf32> to vector<256x32xf32>
    %c0_2 = arith.constant 0 : index
    %c0_3 = arith.constant 0 : index
    %c0_4 = arith.constant 0 : index
    %2 = vector.load %arg2[%c0_2, %c0_3, %c0_4] : memref<1x32x32xf32, #tpu.memory_space<vmem>>, vector<1x32x32xf32>
    %3 = vector.shape_cast %2 : vector<1x32x32xf32> to vector<32x32xf32>
    %c0_5 = arith.constant 0 : index
    %c0_6 = arith.constant 0 : index
    %c0_7 = arith.constant 0 : index
    %4 = vector.load %arg3[%c0_5, %c0_6, %c0_7] : memref<1x32x32xf32, #tpu.memory_space<vmem>>, vector<1x32x32xf32>
    %5 = vector.shape_cast %4 : vector<1x32x32xf32> to vector<32x32xf32>
    %c0_8 = arith.constant 0 : index
    %c0_9 = arith.constant 0 : index
    %c0_10 = arith.constant 0 : index
    %6 = vector.load %arg4[%c0_8, %c0_9, %c0_10] : memref<1x256x32xf32, #tpu.memory_space<vmem>>, vector<1x256x32xf32>
    %7 = vector.shape_cast %6 : vector<1x256x32xf32> to vector<256x32xf32>
    %cst = arith.constant dense<0.000000e+00> : vector<256x32xf32>
    %8 = tpu.matmul %1, %3, %cst {dimension_numbers = #tpu.dot_dimension_numbers<[1], [1], [0], [0], [0, 0, 1, 0], [], []>} : vector<256x32xf32>, vector<32x32xf32>, vector<256x32xf32> -> vector<256x32xf32>
    %cst_11 = arith.constant 0.176776692 : f32
    %9 = vector.broadcast %cst_11 : f32 to vector<256x32xf32>
    %10 = arith.mulf %8, %9 : vector<256x32xf32>
    %cst_12 = arith.constant dense<0xFF800000> : vector<256xf32>
    %11 = vector.multi_reduction <maximumf>, %10, %cst_12 [1] : vector<256x32xf32> to vector<256xf32>
    %12 = vector.shape_cast %11 : vector<256xf32> to vector<256x1xf32>
    %13 = vector.broadcast %12 : vector<256x1xf32> to vector<256x32xf32>
    %14 = arith.subf %10, %13 : vector<256x32xf32>
    %15 = math.exp %14 : vector<256x32xf32>
    %cst_13 = arith.constant dense<0.000000e+00> : vector<256xf32>
    %16 = vector.multi_reduction <add>, %15, %cst_13 [1] : vector<256x32xf32> to vector<256xf32>
    %17 = vector.shape_cast %16 : vector<256xf32> to vector<256x1xf32>
    %cst_14 = arith.constant 1.000000e+00 : f32
    %18 = vector.broadcast %cst_14 : f32 to vector<256x1xf32>
    %19 = arith.divf %18, %17 : vector<256x1xf32>
    %20 = vector.broadcast %19 : vector<256x1xf32> to vector<256x32xf32>
    %21 = arith.mulf %15, %20 : vector<256x32xf32>
    %22 = arith.mulf %21, %7 : vector<256x32xf32>
    %cst_15 = arith.constant dense<0.000000e+00> : vector<256x32xf32>
    %23 = tpu.matmul %22, %5, %cst_15 {dimension_numbers = #tpu.dot_dimension_numbers<[1], [0], [0], [1], [0, 0, 1, 1], [], []>} : vector<256x32xf32>, vector<32x32xf32>, vector<256x32xf32> -> vector<256x32xf32>
    %c0_16 = arith.constant 0 : index
    %c0_17 = arith.constant 0 : index
    %c0_18 = arith.constant 0 : index
    %24 = vector.load %arg5[%c0_16, %c0_17, %c0_18] : memref<1x256x32xf32, #tpu.memory_space<vmem>>, vector<1x256x32xf32>
    %25 = vector.shape_cast %24 : vector<1x256x32xf32> to vector<256x32xf32>
    %26 = vector.shape_cast %23 : vector<256x32xf32> to vector<1x256x32xf32>
    tpu.vector_store %arg5[%c0_16, %c0_17, %c0_18], %26 {strides = array<i32>} : memref<1x256x32xf32, #tpu.memory_space<vmem>>, vector<1x256x32xf32>,
    return
  }
  func.func @transform_0(%arg0: i32) -> (i32, i32, i32) {
    %c0_i32 = arith.constant 0 : i32
    %c0_i32_0 = arith.constant 0 : i32
    %c0_i32_1 = arith.constant 0 : i32
    return %arg0, %c0_i32, %c0_i32_0 : i32, i32, i32
  }
  func.func @transform_1(%arg0: i32) -> (i32, i32, i32) {
    %c0_i32 = arith.constant 0 : i32
    %c0_i32_0 = arith.constant 0 : i32
    %c0_i32_1 = arith.constant 0 : i32
    return %arg0, %c0_i32, %c0_i32_0 : i32, i32, i32
  }
  func.func @transform_2(%arg0: i32) -> (i32, i32, i32) {
    %c0_i32 = arith.constant 0 : i32
    %c0_i32_0 = arith.constant 0 : i32
    %c0_i32_1 = arith.constant 0 : i32
    return %arg0, %c0_i32, %c0_i32_0 : i32, i32, i32
  }
  func.func @transform_3(%arg0: i32) -> (i32, i32, i32) {
    %c0_i32 = arith.constant 0 : i32
    %c0_i32_0 = arith.constant 0 : i32
    %c0_i32_1 = arith.constant 0 : i32
    return %arg0, %c0_i32, %c0_i32_0 : i32, i32, i32
  }
  func.func @transform_4(%arg0: i32) -> (i32, i32, i32) {
    %c0_i32 = arith.constant 0 : i32
    %c0_i32_0 = arith.constant 0 : i32
    %c0_i32_1 = arith.constant 0 : i32
    return %arg0, %c0_i32, %c0_i32_0 : i32, i32, i32
  }
}

</mosaic_0001>

<bundles_post_ra>
// kernel: tpu_custom_call.1
= control target key start
LH: loop header
LB: loop body
LE: loop exit
PB: predicated region body
PF: predicated region fallthrough
CT: control target
= control target key end

     0   :  { %s2019_s15 = smov 0   ;;  %s2578_s0 = inlined_call_operand.vmem [shape: f32[2,256,32], index: 0, kind: input, shape index: {}]   ;;  %s2579_s1 = inlined_call_operand.vmem [shape: f32[2,32,32], index: 1, kind: input, shape index: {}]   ;;  %s2580_s2 = inlined_call_operand.vmem [shape: f32[2,32,32], index: 2, kind: input, shape index: {}]   ;;  %s2581_s3 = inlined_call_operand.vmem [shape: f32[2,256,32], index: 3, kind: input, shape index: {}]   ;;  %s2582_s4 = inlined_call_operand.vmem [shape: f32[2,256,32], index: 4, kind: output, shape index: {}]  }
   0x1 LB: > { %s1556_s16 = sadd.s32 4294967295, %s1992_s15   ;;  %p1560_p0 = scmp.ge.s32.totalorder %s1992_s15, 1  ;;  %s1992_s15 = sphi %s2019_s15, %s14_s15  }
   0x2   : > { %p192_p1 = scmp.lt.s32.totalorder %s1992_s15, 3 }
   0x4   : > { %p193_p2 = pnand %p1560_p0, %p192_p1 }
   0x5   : > { %p233_p3 = scmp.lt.s32.totalorder (!%p193_p2), %s1556_s16, 1  ;;  %vm330_vm0 = vcmask (!%p193_p2), 261120  }
   0x6   : > { %196 = sbr.rel (%p193_p2) target bundleno = 844 (0x34c), region = 36  ;;  %vm1831_vm1 = vmpackc.low (!%p193_p2), %vm330_vm0, %vm330_vm0 }
   0xd   : > { %s2584_s16 = smov (!%p233_p3, %s1556_s16), 1 }
   0xe   : > { %s2030_s17 = sshll.u32 %s2584_s16, 8  ;;  %s1642_s18 = sshll.u32 %s2584_s16, 5 }
   0xf   : > { %s2037_s21 = scalar_lea.vmem %s2578_s0, %s2030_s17  ;;  %s242_s24 = scalar_lea.vmem %s2579_s1, %s1642_s18 }
  0x10   : > { %v290_v0 = vld [vmem:[%s242_s24] sm:$0xff]  ;;  %v291_v1 = vld [vmem:[%s242_s24 + $0x8] sm:$0xff]  ;;  %v292_v2 = vld [vmem:[%s242_s24 + $0x10] sm:$0xff]  ;;  %s247_s27 = scalar_lea.vmem %s2580_s2, %s1642_s18  ;;  %s2407_s30 = scalar_lea.vmem %s2581_s3, %s2030_s17 }
  0x11   : > { %v1830_v3 = vpack.c.bf16 %v291_v1, %v290_v0  ;;  %v293_v4 = vld [vmem:[%s242_s24 + $0x18] sm:$0xff]  ;;  %v258_v5 = vld [vmem:[%s2037_s21] sm:$0xff]  ;;  %v259_v7 = vld [vmem:[%s2037_s21 + $0x8] sm:$0xff]  ;;  %s2509_s7 = scalar_lea.vmem %s2582_s4, %s2030_s17 }
  0x12   : > { %v1836_v6 = vpack.c.bf16 %v293_v4, %v292_v2  ;;  %1726 = vmatprep.mubr.msk.f32.mxu0 %vm330_vm0, %v258_v5  ;;  %v260_v8 = vld [vmem:[%s2037_s21 + $0x10] sm:$0xff]  ;;  %v261_v9 = vld [vmem:[%s2037_s21 + $0x18] sm:$0xff]  ;;  %v262_v10 = vld [vmem:[%s2037_s21 + $0x20] sm:$0xff] }
  0x13   : > { %1832 = vmatprep.subr.msk.bf16.mxu0 %vm1831_vm1, %v1830_v3  ;;  %v263_v11 = vld [vmem:[%s2037_s21 + $0x28] sm:$0xff]  ;;  %v264_v12 = vld [vmem:[%s2037_s21 + $0x30] sm:$0xff]  ;;  %v265_v13 = vld [vmem:[%s2037_s21 + $0x38] sm:$0xff] }
  0x14   : > { %1835 = vmatpush3.bf16.xpose.msk.msra.mxu0 %vm1831_vm1, %v1830_v3  ;;  %v266_v14 = vld [vmem:[%s2037_s21 + $0x40] sm:$0xff]  ;;  %v267_v15 = vld [vmem:[%s2037_s21 + $0x48] sm:$0xff]  ;;  %v268_v16 = vld [vmem:[%s2037_s21 + $0x50] sm:$0xff] }
  0x15   : > { %1838 = vmatprep.subr.msk.bf16.mxu0 %vm1831_vm1, %v1836_v6  ;;  %v269_v17 = vld [vmem:[%s2037_s21 + $0x58] sm:$0xff]  ;;  %v270_v18 = vld [vmem:[%s2037_s21 + $0x60] sm:$0xff]  ;;  %v271_v19 = vld [vmem:[%s2037_s21 + $0x68] sm:$0xff] }
  0x16   : > { %v272_v20 = vld [vmem:[%s2037_s21 + $0x70] sm:$0xff]  ;;  %v273_v21 = vld [vmem:[%s2037_s21 + $0x78] sm:$0xff]  ;;  %v274_v22 = vld [vmem:[%s2037_s21 + $0x80] sm:$0xff] }
  0x17   : > { %v275_v23 = vld [vmem:[%s2037_s21 + $0x88] sm:$0xff]  ;;  %v276_v24 = vld [vmem:[%s2037_s21 + $0x90] sm:$0xff]  ;;  %v277_v25 = vld [vmem:[%s2037_s21 + $0x98] sm:$0xff] }
  0x18   : > { %v278_v26 = vld [vmem:[%s2037_s21 + $0xa0] sm:$0xff]  ;;  %v279_v27 = vld [vmem:[%s2037_s21 + $0xa8] sm:$0xff]  ;;  %v280_v28 = vld [vmem:[%s2037_s21 + $0xb0] sm:$0xff] }
  0x19   : > { %v281_v29 = vld [vmem:[%s2037_s21 + $0xb8] sm:$0xff]  ;;  %v282_v30 = vld [vmem:[%s2037_s21 + $0xc0] sm:$0xff]  ;;  %v283_v31 = vld [vmem:[%s2037_s21 + $0xc8] sm:$0xff] }
  0x1a   : > { %v284_v32 = vld [vmem:[%s2037_s21 + $0xd0] sm:$0xff]  ;;  %v285_v33 = vld [vmem:[%s2037_s21 + $0xd8] sm:$0xff]  ;;  %v286_v34 = vld [vmem:[%s2037_s21 + $0xe0] sm:$0xff] }
  0x1b   : > { %v287_v35 = vld [vmem:[%s2037_s21 + $0xe8] sm:$0xff]  ;;  %v288_v36 = vld [vmem:[%s2037_s21 + $0xf0] sm:$0xff]  ;;  %v289_v37 = vld [vmem:[%s2037_s21 + $0xf8] sm:$0xff] }
  0x1c   : > { %1841 = vmatpush3.bf16.xpose.msk.msra.mxu0 %vm1831_vm1, %v1836_v6 }
  0x23   : > { %1727 = vmatmul.mubr.msk.f32.vlgmr.msra.gmra.mrb[0].mxu0 %vm330_vm0, %v259_v7 }
  0x24   : > { %1729 = vmatprep.mubr.msk.f32.mxu0 %vm330_vm0, %v260_v8 }
  0x27   : > { %1730 = vmatmul.mubr.msk.f32.gmra.mrb[2].mxu0 %vm330_vm0, %v261_v9 }
  0x28   : > { %1732 = vmatprep.mubr.msk.f32.mxu0 %vm330_vm0, %v262_v10 }
  0x2b   : > { %1733 = vmatmul.mubr.msk.f32.gmra.mrb[4].mxu0 %vm330_vm0, %v263_v11 }
  0x2c   : > { %1735 = vmatprep.mubr.msk.f32.mxu0 %vm330_vm0, %v264_v12 }
  0x2f   : > { %1736 = vmatmul.mubr.msk.f32.gmra.mrb[6].mxu0 %vm330_vm0, %v265_v13 }
  0x30   : > { %1738 = vmatprep.mubr.msk.f32.mxu0 %vm330_vm0, %v266_v14 }
  0x33   : > { %1739 = vmatmul.mubr.msk.f32.gmra.mrb[8].mxu0 %vm330_vm0, %v267_v15 }
  0x34   : > { %1741 = vmatprep.mubr.msk.f32.mxu0 %vm330_vm0, %v268_v16 }
  0x37   : > { %1742 = vmatmul.mubr.msk.f32.gmra.mrb[10].mxu0 %vm330_vm0, %v269_v17 }
  0x38   : > { %1744 = vmatprep.mubr.msk.f32.mxu0 %vm330_vm0, %v270_v18 }
  0x3b   : > { %1745 = vmatmul.mubr.msk.f32.gmra.mrb[12].mxu0 %vm330_vm0, %v271_v19 }
  0x3c   : > { %1747 = vmatprep.mubr.msk.f32.mxu0 %vm330_vm0, %v272_v20 }
  0x3f   : > { %1748 = vmatmul.mubr.msk.f32.gmra.mrb[14].mxu0 %vm330_vm0, %v273_v21 }
  0x40   : > { %1750 = vmatprep.mubr.msk.f32.mxu0 %vm330_vm0, %v274_v22 }
  0x43   : > { %1751 = vmatmul.mubr.msk.f32.gmra.mrb[16].mxu0 %vm330_vm0, %v275_v23 }
  0x44   : > { %1753 = vmatprep.mubr.msk.f32.mxu0 %vm330_vm0, %v276_v24 }
  0x47   : > { %1754 = vmatmul.mubr.msk.f32.gmra.mrb[18].mxu0 %vm330_vm0, %v277_v25 }
  0x48   : > { %1756 = vmatprep.mubr.msk.f32.mxu0 %vm330_vm0, %v278_v26 }
  0x4b   : > { %1757 = vmatmul.mubr.msk.f32.gmra.mrb[20].mxu0 %vm330_vm0, %v279_v27 }
  0x4c   : > { %1759 = vmatprep.mubr.msk.f32.mxu0 %vm330_vm0, %v280_v28 }
  0x4f   : > { %1760 = vmatmul.mubr.msk.f32.gmra.mrb[22].mxu0 %vm330_vm0, %v281_v29 }
  0x50   : > { %1762 = vmatprep.mubr.msk.f32.mxu0 %vm330_vm0, %v282_v30 }
  0x53   : > { %1763 = vmatmul.mubr.msk.f32.gmra.mrb[24].mxu0 %vm330_vm0, %v283_v31 }
  0x54   : > { %1765 = vmatprep.mubr.msk.f32.mxu0 %vm330_vm0, %v284_v32 }
  0x57   : > { %1766 = vmatmul.mubr.msk.f32.gmra.mrb[26].mxu0 %vm330_vm0, %v285_v33 }
  0x58   : > { %1768 = vmatprep.mubr.msk.f32.mxu0 %vm330_vm0, %v286_v34 }
  0x5b   : > { %1769 = vmatmul.mubr.msk.f32.gmra.mrb[28].mxu0 %vm330_vm0, %v287_v35 }
  0x5c   : > { %1771 = vmatprep.mubr.msk.f32.mxu0 %vm330_vm0, %v288_v36 }
  0x5f   : > { %1772 = vmatmul.mubr.msk.f32.gmra.mrb[30].mxu0 %vm330_vm0, %v289_v37 }
  0xf6   : > { %v1728_v38 = vpop.f32.mrb[0].mxu0 }
  0xf7   : > { %v505_v39 = vpop.f32.mrb[1].mxu0  ;;  %v2112_v41 = vmul.f32 0.17677669, %v1728_v38 }
  0xf8   : > { %v2110_v40 = vmul.f32 0.17677669, %v505_v39 }
  0xf9   : > { %v699_v48 = vsel %vm330_vm0, %v2112_v41, -inf }
  0xfa   : > { %v1731_v42 = vpop.f32.mrb[2].mxu0  ;;  %v696_v43 = vsel %vm330_vm0, %v2110_v40, -inf }
  0xfb   : > { %697 = vmax.xlane.f32.xlu0 %v696_v43  ;;  %v515_v44 = vpop.f32.mrb[3].mxu0  ;;  %v2118_v46 = vmul.f32 0.17677669, %v1731_v42 }
  0xfc   : > { %v2116_v45 = vmul.f32 0.17677669, %v515_v44 }
  0xfd   : > { %v705_v54 = vsel %vm330_vm0, %v2118_v46, -inf }
  0xfe   : > { %v1734_v47 = vpop.f32.mrb[4].mxu0  ;;  %v702_v49 = vsel %vm330_vm0, %v2116_v45, -inf }
  0xff   : > { %700 = vmax.xlane.f32.xlu0 %v699_v48  ;;  %703 = vmax.xlane.f32.xlu1 %v702_v49  ;;  %v525_v50 = vpop.f32.mrb[5].mxu0  ;;  %v2126_v52 = vmul.f32 0.17677669, %v1734_v47 }
 0x100   : > { %v2124_v51 = vmul.f32 0.17677669, %v525_v50 }
 0x101   : > { %v711_v60 = vsel %vm330_vm0, %v2126_v52, -inf }
 0x102   : > { %v1737_v53 = vpop.f32.mrb[6].mxu0  ;;  %v708_v55 = vsel %vm330_vm0, %v2124_v51, -inf }
 0x103   : > { %706 = vmax.xlane.f32.xlu1 %v705_v54  ;;  %709 = vmax.xlane.f32.xlu0 %v708_v55  ;;  %v535_v56 = vpop.f32.mrb[7].mxu0  ;;  %v2134_v58 = vmul.f32 0.17677669, %v1737_v53 }
 0x104   : > { %v2132_v57 = vmul.f32 0.17677669, %v535_v56 }
 0x105   : > { %v717_v2 = vsel %vm330_vm0, %v2134_v58, -inf }
 0x106   : > { %v1740_v59 = vpop.f32.mrb[8].mxu0  ;;  %v714_v61 = vsel %vm330_vm0, %v2132_v57, -inf }
 0x107   : > { %712 = vmax.xlane.f32.xlu1 %v711_v60  ;;  %715 = vmax.xlane.f32.xlu0 %v714_v61  ;;  %v545_v62 = vpop.f32.mrb[9].mxu0  ;;  %v2142_v0 = vmul.f32 0.17677669, %v1740_v59 }
 0x108   : > { %v2140_v63 = vmul.f32 0.17677669, %v545_v62 }
 0x109   : > { %v723_v8 = vsel %vm330_vm0, %v2142_v0, -inf }
 0x10a   : > { %v1743_v1 = vpop.f32.mrb[10].mxu0  ;;  %v720_v3 = vsel %vm330_vm0, %v2140_v63, -inf }
 0x10b   : > { %718 = vmax.xlane.f32.xlu1 %v717_v2  ;;  %721 = vmax.xlane.f32.xlu0 %v720_v3  ;;  %v555_v4 = vpop.f32.mrb[11].mxu0  ;;  %v2150_v6 = vmul.f32 0.17677669, %v1743_v1 }
 0x10c   : > { %v2148_v5 = vmul.f32 0.17677669, %v555_v4 }
 0x10d   : > { %v729_v14 = vsel %vm330_vm0, %v2150_v6, -inf }
 0x10e   : > { %v1746_v7 = vpop.f32.mrb[12].mxu0  ;;  %v726_v9 = vsel %vm330_vm0, %v2148_v5, -inf }
 0x10f   : > { %724 = vmax.xlane.f32.xlu1 %v723_v8  ;;  %727 = vmax.xlane.f32.xlu0 %v726_v9  ;;  %v565_v10 = vpop.f32.mrb[13].mxu0  ;;  %v2158_v12 = vmul.f32 0.17677669, %v1746_v7 }
 0x110   : > { %v2156_v11 = vmul.f32 0.17677669, %v565_v10 }
 0x111   : > { %v735_v20 = vsel %vm330_vm0, %v2158_v12, -inf }
 0x112   : > { %v1749_v13 = vpop.f32.mrb[14].mxu0  ;;  %v732_v15 = vsel %vm330_vm0, %v2156_v11, -inf }
 0x113   : > { %730 = vmax.xlane.f32.xlu1 %v729_v14  ;;  %733 = vmax.xlane.f32.xlu0 %v732_v15  ;;  %v575_v16 = vpop.f32.mrb[15].mxu0  ;;  %v2166_v18 = vmul.f32 0.17677669, %v1749_v13 }
 0x114   : > { %v2164_v17 = vmul.f32 0.17677669, %v575_v16 }
 0x115   : > { %v741_v26 = vsel %vm330_vm0, %v2166_v18, -inf }
 0x116   : > { %v1752_v19 = vpop.f32.mrb[16].mxu0  ;;  %v738_v21 = vsel %vm330_vm0, %v2164_v17, -inf }
 0x117   : > { %736 = vmax.xlane.f32.xlu1 %v735_v20  ;;  %739 = vmax.xlane.f32.xlu0 %v738_v21  ;;  %v585_v22 = vpop.f32.mrb[17].mxu0  ;;  %v2174_v24 = vmul.f32 0.17677669, %v1752_v19 }
 0x118   : > { %v2172_v23 = vmul.f32 0.17677669, %v585_v22 }
 0x119   : > { %v747_v32 = vsel %vm330_vm0, %v2174_v24, -inf }
 0x11a   : > { %v1755_v25 = vpop.f32.mrb[18].mxu0  ;;  %v744_v27 = vsel %vm330_vm0, %v2172_v23, -inf }
 0x11b   : > { %742 = vmax.xlane.f32.xlu1 %v741_v26  ;;  %745 = vmax.xlane.f32.xlu0 %v744_v27  ;;  %v595_v28 = vpop.f32.mrb[19].mxu0  ;;  %v2182_v30 = vmul.f32 0.17677669, %v1755_v25 }
 0x11c   : > { %v2180_v29 = vmul.f32 0.17677669, %v595_v28 }
 0x11d   : > { %v753_v38 = vsel %vm330_vm0, %v2182_v30, -inf }
 0x11e   : > { %v1758_v31 = vpop.f32.mrb[20].mxu0  ;;  %v750_v33 = vsel %vm330_vm0, %v2180_v29, -inf }
 0x11f   : > { %748 = vmax.xlane.f32.xlu1 %v747_v32  ;;  %751 = vmax.xlane.f32.xlu0 %v750_v33  ;;  %v605_v34 = vpop.f32.mrb[21].mxu0  ;;  %v2190_v36 = vmul.f32 0.17677669, %v1758_v31 }
 0x120   : > { %v2188_v35 = vmul.f32 0.17677669, %v605_v34 }
 0x121   : > { %v759_v48 = vsel %vm330_vm0, %v2190_v36, -inf }
 0x122   : > { %v1761_v37 = vpop.f32.mrb[22].mxu0  ;;  %v756_v39 = vsel %vm330_vm0, %v2188_v35, -inf }
 0x123   : > { %754 = vmax.xlane.f32.xlu1 %v753_v38  ;;  %757 = vmax.xlane.f32.xlu0 %v756_v39  ;;  %v615_v42 = vpop.f32.mrb[23].mxu0  ;;  %v2198_v44 = vmul.f32 0.17677669, %v1761_v37 }
 0x124   : > { %v2196_v43 = vmul.f32 0.17677669, %v615_v42 }
 0x125   : > { %v765_v56 = vsel %vm330_vm0, %v2198_v44, -inf }
 0x126   : > { %v1764_v47 = vpop.f32.mrb[24].mxu0  ;;  %v762_v49 = vsel %vm330_vm0, %v2196_v43, -inf }
 0x127   : > { %760 = vmax.xlane.f32.xlu1 %v759_v48  ;;  %763 = vmax.xlane.f32.xlu0 %v762_v49  ;;  %v625_v50 = vpop.f32.mrb[25].mxu0  ;;  %v2206_v54 = vmul.f32 0.17677669, %v1764_v47 }
 0x128   : > { %v2204_v53 = vmul.f32 0.17677669, %v625_v50 }
 0x129   : > { %v771_v2 = vsel %vm330_vm0, %v2206_v54, -inf }
 0x12a   : > { %v1767_v55 = vpop.f32.mrb[26].mxu0  ;;  %v768_v59 = vsel %vm330_vm0, %v2204_v53, -inf }
 0x12b   : > { %766 = vmax.xlane.f32.xlu1 %v765_v56  ;;  %769 = vmax.xlane.f32.xlu0 %v768_v59  ;;  %v635_v60 = vpop.f32.mrb[27].mxu0  ;;  %v2214_v62 = vmul.f32 0.17677669, %v1767_v55 }
 0x12c   : > { %v2212_v61 = vmul.f32 0.17677669, %v635_v60 }
 0x12d   : > { %v777_v10 = vsel %vm330_vm0, %v2214_v62, -inf }
 0x12e   : > { %v1770_v1 = vpop.f32.mrb[28].mxu0  ;;  %v774_v3 = vsel %vm330_vm0, %v2212_v61, -inf }
 0x12f   : > { %772 = vmax.xlane.f32.xlu1 %v771_v2  ;;  %775 = vmax.xlane.f32.xlu0 %v774_v3  ;;  %v645_v4 = vpop.f32.mrb[29].mxu0  ;;  %v2222_v8 = vmul.f32 0.17677669, %v1770_v1 }
 0x130   : > { %v2220_v7 = vmul.f32 0.17677669, %v645_v4 }
 0x131   : > { %v783_v19 = vsel %vm330_vm0, %v2222_v8, -inf }
 0x132   : > { %v1773_v9 = vpop.f32.mrb[30].mxu0  ;;  %v780_v13 = vsel %vm330_vm0, %v2220_v7, -inf }
 0x133   : > { %778 = vmax.xlane.f32.xlu1 %v777_v10  ;;  %781 = vmax.xlane.f32.xlu0 %v780_v13  ;;  %v655_v14 = vpop.f32.mrb[31].mxu0  ;;  %v2230_v16 = vmul.f32 0.17677669, %v1773_v9 }
 0x134   : > { %v2228_v15 = vmul.f32 0.17677669, %v655_v14 }
 0x135   : > { %v789_v21 = vsel %vm330_vm0, %v2230_v16, -inf }
 0x136   : > { %v786_v20 = vsel %vm330_vm0, %v2228_v15, -inf }
 0x137   : > { %784 = vmax.xlane.f32.xlu1 %v783_v19  ;;  %787 = vmax.xlane.f32.xlu0 %v786_v20 }
 0x13b   : > { %790 = vmax.xlane.f32.xlu1 %v789_v21 }
 0x188   : > { %v698_v22 = vpop.xlane.xlu0 %697 }
 0x189   : > { %v792_v25 = vsub.f32 %v2110_v40, %v698_v22 }
 0x18b   : > { %v824_v26 = vmul.f32 1.442695, %v792_v25 }
 0x18c   : > { %v701_v27 = vpop.xlane.xlu0 %700  ;;  %v704_v28 = vpop.xlane.xlu1 %703 }
 0x18d   : > { %1858 = vpow2.f32 %v824_v26  ;;  %v793_v31 = vsub.f32 %v2112_v41, %v701_v27  ;;  %v794_v32 = vsub.f32 %v2116_v45, %v704_v28 }
 0x18f   : > { %v826_v33 = vmul.f32 1.442695, %v793_v31  ;;  %v828_v34 = vmul.f32 1.442695, %v794_v32 }
 0x190   : > { %v707_v37 = vpop.xlane.xlu1 %706  ;;  %v710_v38 = vpop.xlane.xlu0 %709 }
 0x191   : > { %1860 = vpow2.f32 %v826_v33  ;;  %v795_v39 = vsub.f32 %v2118_v46, %v707_v37  ;;  %v796_v42 = vsub.f32 %v2124_v51, %v710_v38 }
 0x192   : > { %1862 = vpow2.f32 %v828_v34 }
 0x193   : > { %v830_v47 = vmul.f32 1.442695, %v795_v39  ;;  %v832_v40 = vmul.f32 1.442695, %v796_v42 }
 0x194   : > { %v713_v48 = vpop.xlane.xlu1 %712  ;;  %v716_v49 = vpop.xlane.xlu0 %715 }
 0x195   : > { %1864 = vpow2.f32 %v830_v47  ;;  %v797_v50 = vsub.f32 %v2126_v52, %v713_v48  ;;  %v798_v41 = vsub.f32 %v2132_v57, %v716_v49 }
 0x196   : > { %1866 = vpow2.f32 %v832_v40 }
 0x197   : > { %v2245_v45 = vpop.eup %1858  ;;  %v834_v55 = vmul.f32 1.442695, %v797_v50  ;;  %v836_v56 = vmul.f32 1.442695, %v798_v41 }
 0x198   : > { %v719_v59 = vpop.xlane.xlu1 %718  ;;  %v722_v60 = vpop.xlane.xlu0 %721  ;;  %v888_v46 = vsel %vm330_vm0, %v2245_v45, 0.0 }
 0x199   : > { %1868 = vpow2.f32 %v834_v55  ;;  %v799_v51 = vsub.f32 %v2134_v58, %v719_v59  ;;  %v800_v1 = vsub.f32 %v2140_v63, %v722_v60  ;;  %889 = vadd.xlane.f32.xlu0 %v888_v46 }
 0x19a   : > { %1870 = vpow2.f32 %v836_v56 }
 0x19b   : > { %v2251_v52 = vpop.eup %1860  ;;  %v838_v57 = vmul.f32 1.442695, %v799_v51  ;;  %v840_v2 = vmul.f32 1.442695, %v800_v1 }
 0x19c   : > { %v2253_v3 = vpop.eup %1862  ;;  %v725_v4 = vpop.xlane.xlu1 %724  ;;  %v891_v10 = vsel %vm330_vm0, %v2251_v52, 0.0 }
 0x19d   : > { %v728_v9 = vpop.xlane.xlu0 %727  ;;  %1872 = vpow2.f32 %v838_v57  ;;  %v801_v13 = vsub.f32 %v2142_v0, %v725_v4  ;;  %892 = vadd.xlane.f32.xlu1 %v891_v10  ;;  %v894_v63 = vsel %vm330_vm0, %v2253_v3, 0.0 }
 0x19e   : > { %v802_v58 = vsub.f32 %v2148_v5, %v728_v9  ;;  %1874 = vpow2.f32 %v840_v2  ;;  %895 = vadd.xlane.f32.xlu0 %v894_v63  ;;  %v294_v63 = vld [vmem:[%s247_s27] sm:$0xff] }
 0x19f   : > { %v2261_v14 = vpop.eup %1864  ;;  %v842_v19 = vmul.f32 1.442695, %v801_v13 }
 0x1a0   : > { %v844_v20 = vmul.f32 1.442695, %v802_v58  ;;  %v2263_v21 = vpop.eup %1866  ;;  %v731_v22 = vpop.xlane.xlu1 %730  ;;  %v897_v26 = vsel %vm330_vm0, %v2261_v14, 0.0 }
 0x1a1   : > { %v734_v25 = vpop.xlane.xlu0 %733  ;;  %1876 = vpow2.f32 %v842_v19  ;;  %v803_v0 = vsub.f32 %v2150_v6, %v731_v22  ;;  %898 = vadd.xlane.f32.xlu1 %v897_v26  ;;  %v900_v27 = vsel %vm330_vm0, %v2263_v21, 0.0  ;;  %v295_v19 = vld [vmem:[%s247_s27 + $0x8] sm:$0xff] }
 0x1a2   : > { %v804_v5 = vsub.f32 %v2156_v11, %v734_v25  ;;  %1878 = vpow2.f32 %v844_v20  ;;  %901 = vadd.xlane.f32.xlu0 %v900_v27  ;;  %v1842_v26 = vpack.c.bf16 %v295_v19, %v294_v63 }
 0x1a3   : > { %v2271_v28 = vpop.eup %1868  ;;  %v846_v31 = vmul.f32 1.442695, %v803_v0 }
 0x1a4   : > { %v848_v32 = vmul.f32 1.442695, %v804_v5  ;;  %v2273_v33 = vpop.eup %1870  ;;  %v737_v34 = vpop.xlane.xlu1 %736  ;;  %v903_v38 = vsel %vm330_vm0, %v2271_v28, 0.0  ;;  %1843 = vmatprep.subr.bf16.mxu1 %v1842_v26 }
 0x1a5   : > { %v740_v37 = vpop.xlane.xlu0 %739  ;;  %1880 = vpow2.f32 %v846_v31  ;;  %v805_v6 = vsub.f32 %v2158_v12, %v737_v34  ;;  %904 = vadd.xlane.f32.xlu1 %v903_v38  ;;  %v906_v39 = vsel %vm330_vm0, %v2273_v33, 0.0  ;;  %1845 = vmatpush3.bf16.msra.mxu1 %v1842_v26 }
 0x1a6   : > { %v806_v11 = vsub.f32 %v2164_v17, %v740_v37  ;;  %1882 = vpow2.f32 %v848_v32  ;;  %907 = vadd.xlane.f32.xlu0 %v906_v39  ;;  %v297_v37 = vld [vmem:[%s247_s27 + $0x18] sm:$0xff] }
 0x1a7   : > { %v2281_v42 = vpop.eup %1872  ;;  %v850_v47 = vmul.f32 1.442695, %v805_v6 }
 0x1a8   : > { %v852_v40 = vmul.f32 1.442695, %v806_v11  ;;  %v2283_v48 = vpop.eup %1874  ;;  %v743_v49 = vpop.xlane.xlu1 %742  ;;  %v909_v41 = vsel %vm330_vm0, %v2281_v42, 0.0 }
 0x1a9   : > { %v746_v50 = vpop.xlane.xlu0 %745  ;;  %1884 = vpow2.f32 %v850_v47  ;;  %v807_v12 = vsub.f32 %v2166_v18, %v743_v49  ;;  %910 = vadd.xlane.f32.xlu1 %v909_v41  ;;  %v912_v55 = vsel %vm330_vm0, %v2283_v48, 0.0 }
 0x1aa   : > { %v808_v17 = vsub.f32 %v2172_v23, %v746_v50  ;;  %1886 = vpow2.f32 %v852_v40  ;;  %913 = vadd.xlane.f32.xlu0 %v912_v55 }
 0x1ab   : > { %v2291_v56 = vpop.eup %1876  ;;  %v854_v59 = vmul.f32 1.442695, %v807_v12 }
 0x1ac   : > { %v856_v60 = vmul.f32 1.442695, %v808_v17  ;;  %v2293_v46 = vpop.eup %1878  ;;  %v749_v51 = vpop.xlane.xlu1 %748  ;;  %v915_v18 = vsel %vm330_vm0, %v2291_v56, 0.0 }
 0x1ad   : > { %v752_v1 = vpop.xlane.xlu0 %751  ;;  %1888 = vpow2.f32 %v854_v59  ;;  %v809_v23 = vsub.f32 %v2174_v24, %v749_v51  ;;  %916 = vadd.xlane.f32.xlu1 %v915_v18  ;;  %v918_v2 = vsel %vm330_vm0, %v2293_v46, 0.0 }
 0x1ae   : > { %v810_v57 = vsub.f32 %v2180_v29, %v752_v1  ;;  %1890 = vpow2.f32 %v856_v60  ;;  %919 = vadd.xlane.f32.xlu0 %v918_v2 }
 0x1af   : > { %v2301_v4 = vpop.eup %1880  ;;  %v858_v9 = vmul.f32 1.442695, %v809_v23 }
 0x1b0   : > { %v860_v10 = vmul.f32 1.442695, %v810_v57  ;;  %v2308_v13 = vpop.eup %1882  ;;  %v755_v24 = vpop.xlane.xlu1 %754  ;;  %v921_v29 = vsel %vm330_vm0, %v2301_v4, 0.0 }
 0x1b1   : > { %v758_v58 = vpop.xlane.xlu0 %757  ;;  %1892 = vpow2.f32 %v858_v9  ;;  %v811_v20 = vsub.f32 %v2182_v30, %v755_v24  ;;  %922 = vadd.xlane.f32.xlu1 %v921_v29  ;;  %v924_v25 = vsel %vm330_vm0, %v2308_v13, 0.0 }
 0x1b2   : > { %v812_v22 = vsub.f32 %v2188_v35, %v758_v58  ;;  %1894 = vpow2.f32 %v860_v10  ;;  %925 = vadd.xlane.f32.xlu0 %v924_v25  ;;  %v296_v35 = vld [vmem:[%s247_s27 + $0x10] sm:$0xff] }
 0x1b3   : > { %v2316_v0 = vpop.eup %1884  ;;  %v862_v5 = vmul.f32 1.442695, %v811_v20  ;;  %v1846_v39 = vpack.c.bf16 %v297_v37, %v296_v35 }
 0x1b4   : > { %v864_v27 = vmul.f32 1.442695, %v812_v22  ;;  %v2318_v31 = vpop.eup %1886  ;;  %v761_v32 = vpop.xlane.xlu1 %760  ;;  %v927_v30 = vsel %vm330_vm0, %v2316_v0, 0.0 }
 0x1b5   : > { %v764_v34 = vpop.xlane.xlu0 %763  ;;  %1896 = vpow2.f32 %v862_v5  ;;  %v813_v38 = vsub.f32 %v2190_v36, %v761_v32  ;;  %928 = vadd.xlane.f32.xlu1 %v927_v30  ;;  %v930_v11 = vsel %vm330_vm0, %v2318_v31, 0.0  ;;  %1847 = vmatprep.subr.bf16.mxu1 %v1846_v39 }
 0x1b6   : > { %v814_v6 = vsub.f32 %v2196_v43, %v764_v34  ;;  %1898 = vpow2.f32 %v864_v27  ;;  %931 = vadd.xlane.f32.xlu0 %v930_v11  ;;  %1849 = vmatpush3.bf16.msra.mxu1 %v1846_v39 }
 0x1b7   : > { %v2326_v47 = vpop.eup %1888  ;;  %v866_v40 = vmul.f32 1.442695, %v813_v38 }
 0x1b8   : > { %v868_v49 = vmul.f32 1.442695, %v814_v6  ;;  %v2328_v50 = vpop.eup %1890  ;;  %v767_v41 = vpop.xlane.xlu1 %766  ;;  %v933_v36 = vsel %vm330_vm0, %v2326_v47, 0.0 }
 0x1b9   : > { %v770_v12 = vpop.xlane.xlu0 %769  ;;  %1900 = vpow2.f32 %v866_v40  ;;  %v815_v43 = vsub.f32 %v2198_v44, %v767_v41  ;;  %934 = vadd.xlane.f32.xlu1 %v933_v36  ;;  %v936_v55 = vsel %vm330_vm0, %v2328_v50, 0.0 }
 0x1ba   : > { %v816_v17 = vsub.f32 %v2204_v53, %v770_v12  ;;  %1902 = vpow2.f32 %v868_v49  ;;  %937 = vadd.xlane.f32.xlu0 %v936_v55 }
 0x1bb   : > { %v2336_v59 = vpop.eup %1892  ;;  %v870_v60 = vmul.f32 1.442695, %v815_v43 }
 0x1bc   : > { %v872_v51 = vmul.f32 1.442695, %v816_v17  ;;  %v2338_v1 = vpop.eup %1894  ;;  %v773_v18 = vpop.xlane.xlu1 %772  ;;  %v939_v44 = vsel %vm330_vm0, %v2336_v59, 0.0 }
 0x1bd   : > { %v776_v23 = vpop.xlane.xlu0 %775  ;;  %1904 = vpow2.f32 %v870_v60  ;;  %v817_v53 = vsub.f32 %v2206_v54, %v773_v18  ;;  %940 = vadd.xlane.f32.xlu1 %v939_v44  ;;  %v942_v2 = vsel %vm330_vm0, %v2338_v1, 0.0 }
 0x1be   : > { %v818_v57 = vsub.f32 %v2212_v61, %v776_v23  ;;  %1906 = vpow2.f32 %v872_v51  ;;  %943 = vadd.xlane.f32.xlu0 %v942_v2 }
 0x1bf   : > { %v2346_v9 = vpop.eup %1896  ;;  %v874_v10 = vmul.f32 1.442695, %v817_v53 }
 0x1c0   : > { %v876_v24 = vmul.f32 1.442695, %v818_v57  ;;  %v2348_v58 = vpop.eup %1898  ;;  %v779_v29 = vpop.xlane.xlu1 %778  ;;  %v945_v19 = vsel %vm330_vm0, %v2346_v9, 0.0 }
 0x1c1   : > { %v782_v63 = vpop.xlane.xlu0 %781  ;;  %1908 = vpow2.f32 %v874_v10  ;;  %v819_v54 = vsub.f32 %v2214_v62, %v779_v29  ;;  %946 = vadd.xlane.f32.xlu1 %v945_v19  ;;  %v948_v20 = vsel %vm330_vm0, %v2348_v58, 0.0  ;;  %v298_v19 = vld [vmem:[%s2407_s30] sm:$0xff] }
 0x1c2   : > { %v820_v61 = vsub.f32 %v2220_v7, %v782_v63  ;;  %1910 = vpow2.f32 %v876_v24  ;;  %949 = vadd.xlane.f32.xlu0 %v948_v20 }
 0x1c3   : > { %v2356_v22 = vpop.eup %1900  ;;  %v878_v25 = vmul.f32 1.442695, %v819_v54 }
 0x1c4   : > { %v880_v26 = vmul.f32 1.442695, %v820_v61  ;;  %v2358_v5 = vpop.eup %1902  ;;  %v785_v27 = vpop.xlane.xlu1 %784  ;;  %v951_v34 = vsel %vm330_vm0, %v2356_v22, 0.0 }
 0x1c5   : > { %v788_v32 = vpop.xlane.xlu0 %787  ;;  %1912 = vpow2.f32 %v878_v25  ;;  %v821_v62 = vsub.f32 %v2222_v8, %v785_v27  ;;  %952 = vadd.xlane.f32.xlu1 %v951_v34  ;;  %v954_v30 = vsel %vm330_vm0, %v2358_v5, 0.0  ;;  %v299_v27 = vld [vmem:[%s2407_s30 + $0x8] sm:$0xff] }
 0x1c6   : > { %v822_v7 = vsub.f32 %v2228_v15, %v788_v32  ;;  %1914 = vpow2.f32 %v880_v26  ;;  %955 = vadd.xlane.f32.xlu0 %v954_v30 }
 0x1c7   : > { %v2366_v35 = vpop.eup %1904  ;;  %v882_v37 = vmul.f32 1.442695, %v821_v62 }
 0x1c8   : > { %v884_v38 = vmul.f32 1.442695, %v822_v7  ;;  %v2368_v6 = vpop.eup %1906  ;;  %v791_v11 = vpop.xlane.xlu1 %790  ;;  %v957_v39 = vsel %vm330_vm0, %v2366_v35, 0.0  ;;  %v300_v7 = vld [vmem:[%s2407_s30 + $0x10] sm:$0xff] }
 0x1c9   : > { %1916 = vpow2.f32 %v882_v37  ;;  %v823_v8 = vsub.f32 %v2230_v16, %v791_v11  ;;  %958 = vadd.xlane.f32.xlu1 %v957_v39  ;;  %v960_v15 = vsel %vm330_vm0, %v2368_v6, 0.0  ;;  %v301_v39 = vld [vmem:[%s2407_s30 + $0x18] sm:$0xff] }
 0x1ca   : > { %1918 = vpow2.f32 %v884_v38  ;;  %961 = vadd.xlane.f32.xlu0 %v960_v15 }
 0x1cb   : > { %v2375_v40 = vpop.eup %1908  ;;  %v886_v49 = vmul.f32 1.442695, %v823_v8 }
 0x1cc   : > { %v2377_v41 = vpop.eup %1910  ;;  %v963_v12 = vsel %vm330_vm0, %v2375_v40, 0.0 }
 0x1cd   : > { %1920 = vpow2.f32 %v886_v49  ;;  %964 = vadd.xlane.f32.xlu1 %v963_v12  ;;  %v966_v36 = vsel %vm330_vm0, %v2377_v41, 0.0  ;;  %v302_v12 = vld [vmem:[%s2407_s30 + $0x20] sm:$0xff] }
 0x1ce   : > { %967 = vadd.xlane.f32.xlu0 %v966_v36 }
 0x1cf   : > { %v2383_v16 = vpop.eup %1912 }
 0x1d0   : > { %v2385_v43 = vpop.eup %1914  ;;  %v969_v17 = vsel %vm330_vm0, %v2383_v16, 0.0 }
 0x1d1   : > { %970 = vadd.xlane.f32.xlu1 %v969_v17  ;;  %v972_v55 = vsel %vm330_vm0, %v2385_v43, 0.0 }
 0x1d2   : > { %973 = vadd.xlane.f32.xlu0 %v972_v55 }
 0x1d3   : > { %v2391_v60 = vpop.eup %1916 }
 0x1d4   : > { %v2393_v51 = vpop.eup %1918  ;;  %v975_v18 = vsel %vm330_vm0, %v2391_v60, 0.0 }
 0x1d5   : > { %976 = vadd.xlane.f32.xlu1 %v975_v18  ;;  %v978_v23 = vsel %vm330_vm0, %v2393_v51, 0.0  ;;  %v303_v18 = vld [vmem:[%s2407_s30 + $0x28] sm:$0xff] }
 0x1d6   : > { %979 = vadd.xlane.f32.xlu0 %v978_v23 }
 0x1d7   : > { %v2399_v44 = vpop.eup %1920 }
 0x1d8   : > { %v981_v53 = vsel %vm330_vm0, %v2399_v44, 0.0 }
 0x1d9   : > { %982 = vadd.xlane.f32.xlu1 %v981_v53 }
 0x226   : > { %v890_v57 = vpop.xlane.xlu0 %889 }
 0x227   : > { %1922 = vrcp.f32 %v890_v57  ;;  %v304_v57 = vld [vmem:[%s2407_s30 + $0x30] sm:$0xff] }
 0x22a   : > { %v893_v2 = vpop.xlane.xlu1 %892 }
 0x22b   : > { %1924 = vrcp.f32 %v893_v2  ;;  %v896_v10 = vpop.xlane.xlu0 %895 }
 0x22c   : > { %1926 = vrcp.f32 %v896_v10 }
 0x22e   : > { %v899_v24 = vpop.xlane.xlu1 %898 }
 0x22f   : > { %1928 = vrcp.f32 %v899_v24  ;;  %v902_v29 = vpop.xlane.xlu0 %901 }
 0x230   : > { %1930 = vrcp.f32 %v902_v29 }
 0x231   : > { %v1923_v63 = vpop.eup %1922 }
 0x232   : > { %v905_v54 = vpop.xlane.xlu1 %904  ;;  %v1048_v61 = vmul.f32 %v1923_v63, %v2245_v45  ;;  %v305_v63 = vld [vmem:[%s2407_s30 + $0x38] sm:$0xff] }
 0x233   : > { %1932 = vrcp.f32 %v905_v54  ;;  %v908_v20 = vpop.xlane.xlu0 %907 }
 0x234   : > { %1934 = vrcp.f32 %v908_v20  ;;  %v1080_v25 = vmul.f32 %v1048_v61, %v298_v19  ;;  %v306_v61 = vld [vmem:[%s2407_s30 + $0x40] sm:$0xff] }
 0x235   : > { %v1925_v26 = vpop.eup %1924 }
 0x236   : > { %v1927_v32 = vpop.eup %1926  ;;  %v911_v34 = vpop.xlane.xlu1 %910  ;;  %1782 = vmatprep.mubr.msk.f32.mxu1 %vm330_vm0, %v1080_v25  ;;  %v1049_v62 = vmul.f32 %v1925_v26, %v2251_v52 }
 0x237   : > { %1936 = vrcp.f32 %v911_v34  ;;  %v914_v30 = vpop.xlane.xlu0 %913  ;;  %v1050_v37 = vmul.f32 %v1927_v32, %v2253_v3  ;;  %v307_v32 = vld [vmem:[%s2407_s30 + $0x48] sm:$0xff] }
 0x238   : > { %1938 = vrcp.f32 %v914_v30  ;;  %v1081_v45 = vmul.f32 %v1049_v62, %v299_v27 }
 0x239   : > { %v1929_v38 = vpop.eup %1928  ;;  %v1082_v11 = vmul.f32 %v1050_v37, %v300_v7  ;;  %v308_v7 = vld [vmem:[%s2407_s30 + $0x50] sm:$0xff] }
 0x23a   : > { %v1931_v8 = vpop.eup %1930  ;;  %v917_v15 = vpop.xlane.xlu1 %916  ;;  %1783 = vmatmul.mubr.msk.f32.vlgmr.msra.gmra.mrb[0].mxu1 %vm330_vm0, %v1081_v45  ;;  %v1051_v49 = vmul.f32 %v1929_v38, %v2261_v14 }
 0x23b   : > { %1940 = vrcp.f32 %v917_v15  ;;  %v920_v52 = vpop.xlane.xlu0 %919  ;;  %1785 = vmatprep.mubr.msk.f32.mxu1 %vm330_vm0, %v1082_v11  ;;  %v1052_v3 = vmul.f32 %v1931_v8, %v2263_v21  ;;  %v309_v11 = vld [vmem:[%s2407_s30 + $0x58] sm:$0xff]  ;;  %v310_v15 = vld [vmem:[%s2407_s30 + $0x60] sm:$0xff] }
 0x23c   : > { %1942 = vrcp.f32 %v920_v52  ;;  %v1083_v36 = vmul.f32 %v1051_v49, %v301_v39 }
 0x23d   : > { %v1933_v17 = vpop.eup %1932  ;;  %v1084_v55 = vmul.f32 %v1052_v3, %v302_v12 }
 0x23e   : > { %v1935_v23 = vpop.eup %1934  ;;  %v923_v53 = vpop.xlane.xlu1 %922  ;;  %1786 = vmatmul.mubr.msk.f32.gmra.mrb[2].mxu1 %vm330_vm0, %v1083_v36  ;;  %v1053_v14 = vmul.f32 %v1933_v17, %v2271_v28  ;;  %v311_v36 = vld [vmem:[%s2407_s30 + $0x68] sm:$0xff] }
 0x23f   : > { %1944 = vrcp.f32 %v923_v53  ;;  %v926_v2 = vpop.xlane.xlu0 %925  ;;  %1788 = vmatprep.mubr.msk.f32.mxu1 %vm330_vm0, %v1084_v55  ;;  %v1054_v21 = vmul.f32 %v1935_v23, %v2273_v33 }
 0x240   : > { %1946 = vrcp.f32 %v926_v2  ;;  %v1085_v10 = vmul.f32 %v1053_v14, %v303_v18  ;;  %v312_v18 = vld [vmem:[%s2407_s30 + $0x70] sm:$0xff]  ;;  %v313_v2 = vld [vmem:[%s2407_s30 + $0x78] sm:$0xff] }
 0x241   : > { %v1937_v24 = vpop.eup %1936  ;;  %v1086_v29 = vmul.f32 %v1054_v21, %v304_v57 }
 0x242   : > { %v1939_v19 = vpop.eup %1938  ;;  %v929_v54 = vpop.xlane.xlu1 %928  ;;  %1789 = vmatmul.mubr.msk.f32.gmra.mrb[4].mxu1 %vm330_vm0, %v1085_v10  ;;  %v1055_v28 = vmul.f32 %v1937_v24, %v2281_v42  ;;  %v314_v24 = vld [vmem:[%s2407_s30 + $0x80] sm:$0xff] }
 0x243   : > { %1948 = vrcp.f32 %v929_v54  ;;  %v932_v20 = vpop.xlane.xlu0 %931  ;;  %1791 = vmatprep.mubr.msk.f32.mxu1 %vm330_vm0, %v1086_v29  ;;  %v1056_v33 = vmul.f32 %v1939_v19, %v2283_v48 }
 0x244   : > { %1950 = vrcp.f32 %v932_v20  ;;  %v1087_v25 = vmul.f32 %v1055_v28, %v305_v63  ;;  %v315_v28 = vld [vmem:[%s2407_s30 + $0x88] sm:$0xff] }
 0x245   : > { %v1941_v26 = vpop.eup %1940  ;;  %v1088_v27 = vmul.f32 %v1056_v33, %v306_v61  ;;  %v316_v33 = vld [vmem:[%s2407_s30 + $0x90] sm:$0xff] }
 0x246   : > { %v1943_v34 = vpop.eup %1942  ;;  %v935_v62 = vpop.xlane.xlu1 %934  ;;  %1792 = vmatmul.mubr.msk.f32.gmra.mrb[6].mxu1 %vm330_vm0, %v1087_v25  ;;  %v1057_v42 = vmul.f32 %v1941_v26, %v2291_v56 }
 0x247   : > { %1952 = vrcp.f32 %v935_v62  ;;  %v938_v30 = vpop.xlane.xlu0 %937  ;;  %1794 = vmatprep.mubr.msk.f32.mxu1 %vm330_vm0, %v1088_v27  ;;  %v1058_v48 = vmul.f32 %v1943_v34, %v2293_v46  ;;  %v317_v34 = vld [vmem:[%s2407_s30 + $0x98] sm:$0xff] }
 0x248   : > { %1954 = vrcp.f32 %v938_v30  ;;  %v1089_v37 = vmul.f32 %v1057_v42, %v307_v32 }
 0x249   : > { %v1945_v45 = vpop.eup %1944  ;;  %v1090_v38 = vmul.f32 %v1058_v48, %v308_v7  ;;  %v318_v7 = vld [vmem:[%s2407_s30 + $0xa0] sm:$0xff] }
 0x24a   : > { %v1947_v39 = vpop.eup %1946  ;;  %v941_v8 = vpop.xlane.xlu1 %940  ;;  %1795 = vmatmul.mubr.msk.f32.gmra.mrb[8].mxu1 %vm330_vm0, %v1089_v37  ;;  %v1059_v56 = vmul.f32 %v1945_v45, %v2301_v4 }
 0x24b   : > { %1956 = vrcp.f32 %v941_v8  ;;  %v944_v49 = vpop.xlane.xlu0 %943  ;;  %1797 = vmatprep.mubr.msk.f32.mxu1 %vm330_vm0, %v1090_v38  ;;  %v1060_v46 = vmul.f32 %v1947_v39, %v2308_v13  ;;  %v319_v38 = vld [vmem:[%s2407_s30 + $0xa8] sm:$0xff]  ;;  %v320_v8 = vld [vmem:[%s2407_s30 + $0xb0] sm:$0xff] }
 0x24c   : > { %1958 = vrcp.f32 %v944_v49  ;;  %v1091_v12 = vmul.f32 %v1059_v56, %v309_v11 }
 0x24d   : > { %v1949_v52 = vpop.eup %1948  ;;  %v1092_v3 = vmul.f32 %v1060_v46, %v310_v15 }
 0x24e   : > { %v1951_v17 = vpop.eup %1950  ;;  %v947_v55 = vpop.xlane.xlu1 %946  ;;  %1798 = vmatmul.mubr.msk.f32.gmra.mrb[10].mxu1 %vm330_vm0, %v1091_v12  ;;  %v1061_v4 = vmul.f32 %v1949_v52, %v2316_v0  ;;  %v321_v12 = vld [vmem:[%s2407_s30 + $0xb8] sm:$0xff] }
 0x24f   : > { %1960 = vrcp.f32 %v947_v55  ;;  %v950_v23 = vpop.xlane.xlu0 %949  ;;  %1800 = vmatprep.mubr.msk.f32.mxu1 %vm330_vm0, %v1092_v3  ;;  %v1062_v13 = vmul.f32 %v1951_v17, %v2318_v31 }
 0x250   : > { %1962 = vrcp.f32 %v950_v23  ;;  %v1093_v53 = vmul.f32 %v1061_v4, %v311_v36  ;;  %v322_v36 = vld [vmem:[%s2407_s30 + $0xc0] sm:$0xff]  ;;  %v323_v23 = vld [vmem:[%s2407_s30 + $0xc8] sm:$0xff] }
 0x251   : > { %v1953_v14 = vpop.eup %1952  ;;  %v1094_v57 = vmul.f32 %v1062_v13, %v312_v18 }
 0x252   : > { %v1955_v21 = vpop.eup %1954  ;;  %v953_v10 = vpop.xlane.xlu1 %952  ;;  %1801 = vmatmul.mubr.msk.f32.gmra.mrb[12].mxu1 %vm330_vm0, %v1093_v53  ;;  %v1063_v0 = vmul.f32 %v1953_v14, %v2326_v47  ;;  %v324_v14 = vld [vmem:[%s2407_s30 + $0xd0] sm:$0xff] }
 0x253   : > { %1964 = vrcp.f32 %v953_v10  ;;  %v956_v29 = vpop.xlane.xlu0 %955  ;;  %1803 = vmatprep.mubr.msk.f32.mxu1 %vm330_vm0, %v1094_v57  ;;  %v1064_v31 = vmul.f32 %v1955_v21, %v2328_v50  ;;  %v325_v10 = vld [vmem:[%s2407_s30 + $0xd8] sm:$0xff] }
 0x254   : > { %1966 = vrcp.f32 %v956_v29  ;;  %v1095_v63 = vmul.f32 %v1063_v0, %v313_v2  ;;  %v326_v29 = vld [vmem:[%s2407_s30 + $0xe0] sm:$0xff] }
 0x255   : > { %v1957_v19 = vpop.eup %1956  ;;  %v1096_v54 = vmul.f32 %v1064_v31, %v314_v24 }
 0x256   : > { %v1959_v61 = vpop.eup %1958  ;;  %v959_v20 = vpop.xlane.xlu1 %958  ;;  %1804 = vmatmul.mubr.msk.f32.gmra.mrb[14].mxu1 %vm330_vm0, %v1095_v63  ;;  %v1065_v47 = vmul.f32 %v1957_v19, %v2336_v59 }
 0x257   : > { %1968 = vrcp.f32 %v959_v20  ;;  %v962_v25 = vpop.xlane.xlu0 %961  ;;  %1806 = vmatprep.mubr.msk.f32.mxu1 %vm330_vm0, %v1096_v54  ;;  %v1066_v50 = vmul.f32 %v1959_v61, %v2338_v1  ;;  %v328_v61 = vld [vmem:[%s2407_s30 + $0xf0] sm:$0xff] }
 0x258   : > { %1970 = vrcp.f32 %v962_v25  ;;  %v1097_v26 = vmul.f32 %v1065_v47, %v315_v28  ;;  %v329_v25 = vld [vmem:[%s2407_s30 + $0xf8] sm:$0xff] }
 0x259   : > { %v1961_v27 = vpop.eup %1960  ;;  %v1098_v32 = vmul.f32 %v1066_v50, %v316_v33 }
 0x25a   : > { %v1963_v62 = vpop.eup %1962  ;;  %v965_v42 = vpop.xlane.xlu1 %964  ;;  %1807 = vmatmul.mubr.msk.f32.gmra.mrb[16].mxu1 %vm330_vm0, %v1097_v26  ;;  %v1067_v59 = vmul.f32 %v1961_v27, %v2346_v9 }
 0x25b   : > { %1972 = vrcp.f32 %v965_v42  ;;  %v968_v30 = vpop.xlane.xlu0 %967  ;;  %1809 = vmatprep.mubr.msk.f32.mxu1 %vm330_vm0, %v1098_v32  ;;  %v1068_v1 = vmul.f32 %v1963_v62, %v2348_v58 }
 0x25c   : > { %1974 = vrcp.f32 %v968_v30  ;;  %v1099_v48 = vmul.f32 %v1067_v59, %v317_v34 }
 0x25d   : > { %v1965_v37 = vpop.eup %1964  ;;  %v1100_v45 = vmul.f32 %v1068_v1, %v318_v7 }
 0x25e   : > { %v1967_v11 = vpop.eup %1966  ;;  %v971_v39 = vpop.xlane.xlu1 %970  ;;  %1810 = vmatmul.mubr.msk.f32.gmra.mrb[18].mxu1 %vm330_vm0, %v1099_v48  ;;  %v1069_v9 = vmul.f32 %v1965_v37, %v2356_v22 }
 0x25f   : > { %1976 = vrcp.f32 %v971_v39  ;;  %v974_v56 = vpop.xlane.xlu0 %973  ;;  %1812 = vmatprep.mubr.msk.f32.mxu1 %vm330_vm0, %v1100_v45  ;;  %v1070_v58 = vmul.f32 %v1967_v11, %v2358_v5 }
 0x260   : > { %1978 = vrcp.f32 %v974_v56  ;;  %v1101_v15 = vmul.f32 %v1069_v9, %v319_v38 }
 0x261   : > { %v1969_v49 = vpop.eup %1968  ;;  %v1102_v46 = vmul.f32 %v1070_v58, %v320_v8 }
 0x262   : > { %v1971_v52 = vpop.eup %1970  ;;  %v977_v3 = vpop.xlane.xlu1 %976  ;;  %1813 = vmatmul.mubr.msk.f32.gmra.mrb[20].mxu1 %vm330_vm0, %v1101_v15  ;;  %v1071_v22 = vmul.f32 %v1969_v49, %v2366_v35 }
 0x263   : > { %1980 = vrcp.f32 %v977_v3  ;;  %v980_v17 = vpop.xlane.xlu0 %979  ;;  %1815 = vmatprep.mubr.msk.f32.mxu1 %vm330_vm0, %v1102_v46  ;;  %v1072_v5 = vmul.f32 %v1971_v52, %v2368_v6 }
 0x264   : > { %1982 = vrcp.f32 %v980_v17  ;;  %v1103_v55 = vmul.f32 %v1071_v22, %v321_v12 }
 0x265   : > { %v1973_v4 = vpop.eup %1972  ;;  %v1104_v18 = vmul.f32 %v1072_v5, %v322_v36 }
 0x266   : > { %v1975_v13 = vpop.eup %1974  ;;  %v983_v53 = vpop.xlane.xlu1 %982  ;;  %1816 = vmatmul.mubr.msk.f32.gmra.mrb[22].mxu1 %vm330_vm0, %v1103_v55  ;;  %v1073_v35 = vmul.f32 %v1973_v4, %v2375_v40 }
 0x267   : > { %1984 = vrcp.f32 %v983_v53  ;;  %1818 = vmatprep.mubr.msk.f32.mxu1 %vm330_vm0, %v1104_v18  ;;  %v1074_v6 = vmul.f32 %v1975_v13, %v2377_v41  ;;  %v327_v41 = vld [vmem:[%s2407_s30 + $0xe8] sm:$0xff] }
 0x268   : > { %v1105_v57 = vmul.f32 %v1073_v35, %v323_v23 }
 0x269   : > { %v1977_v2 = vpop.eup %1976  ;;  %v1106_v21 = vmul.f32 %v1074_v6, %v324_v14 }
 0x26a   : > { %v1979_v0 = vpop.eup %1978  ;;  %1819 = vmatmul.mubr.msk.f32.gmra.mrb[24].mxu1 %vm330_vm0, %v1105_v57  ;;  %v1075_v24 = vmul.f32 %v1977_v2, %v2383_v16 }
 0x26b   : > { %1821 = vmatprep.mubr.msk.f32.mxu1 %vm330_vm0, %v1106_v21  ;;  %v1076_v40 = vmul.f32 %v1979_v0, %v2385_v43 }
 0x26c   : > { %v1107_v31 = vmul.f32 %v1075_v24, %v325_v10 }
 0x26d   : > { %v1981_v63 = vpop.eup %1980  ;;  %v1108_v19 = vmul.f32 %v1076_v40, %v326_v29 }
 0x26e   : > { %v1983_v54 = vpop.eup %1982  ;;  %1822 = vmatmul.mubr.msk.f32.gmra.mrb[26].mxu1 %vm330_vm0, %v1107_v31  ;;  %v1077_v28 = vmul.f32 %v1981_v63, %v2391_v60 }
 0x26f   : > { %1824 = vmatprep.mubr.msk.f32.mxu1 %vm330_vm0, %v1108_v19  ;;  %v1078_v16 = vmul.f32 %v1983_v54, %v2393_v51 }
 0x270   : > { %v1109_v20 = vmul.f32 %v1077_v28, %v327_v41 }
 0x271   : > { %v1985_v47 = vpop.eup %1984  ;;  %v1110_v33 = vmul.f32 %v1078_v16, %v328_v61 }
 0x272   : > { %1825 = vmatmul.mubr.msk.f32.gmra.mrb[28].mxu1 %vm330_vm0, %v1109_v20  ;;  %v1079_v43 = vmul.f32 %v1985_v47, %v2399_v44 }
 0x273   : > { %1827 = vmatprep.mubr.msk.f32.mxu1 %vm330_vm0, %v1110_v33 }
 0x274   : > { %v1111_v50 = vmul.f32 %v1079_v43, %v329_v25 }
 0x276   : > { %1828 = vmatmul.mubr.msk.f32.gmra.mrb[30].mxu1 %vm330_vm0, %v1111_v50 }
 0x30d   : > { %v1784_v60 = vpop.f32.mrb[0].mxu1 }
 0x30e   : > { %1434 = vst.msk [vmem:[%s2509_s7 + $0x8] sm:$0xff] %vm330_vm0, %v1784_v60  ;;  %v1274_v51 = vpop.f32.mrb[1].mxu1 }
 0x30f   : > { %1433 = vst.msk [vmem:[%s2509_s7] sm:$0xff] %vm330_vm0, %v1274_v51 }
 0x311   : > { %v1787_v44 = vpop.f32.mrb[2].mxu1 }
 0x312   : > { %1436 = vst.msk [vmem:[%s2509_s7 + $0x18] sm:$0xff] %vm330_vm0, %v1787_v44  ;;  %v1284_v26 = vpop.f32.mrb[3].mxu1 }
 0x313   : > { %1435 = vst.msk [vmem:[%s2509_s7 + $0x10] sm:$0xff] %vm330_vm0, %v1284_v26 }
 0x315   : > { %v1790_v27 = vpop.f32.mrb[4].mxu1 }
 0x316   : > { %1438 = vst.msk [vmem:[%s2509_s7 + $0x28] sm:$0xff] %vm330_vm0, %v1790_v27  ;;  %v1294_v32 = vpop.f32.mrb[5].mxu1 }
 0x317   : > { %1437 = vst.msk [vmem:[%s2509_s7 + $0x20] sm:$0xff] %vm330_vm0, %v1294_v32 }
 0x319   : > { %v1793_v34 = vpop.f32.mrb[6].mxu1 }
 0x31a   : > { %1440 = vst.msk [vmem:[%s2509_s7 + $0x38] sm:$0xff] %vm330_vm0, %v1793_v34  ;;  %v1304_v62 = vpop.f32.mrb[7].mxu1 }
 0x31b   : > { %1439 = vst.msk [vmem:[%s2509_s7 + $0x30] sm:$0xff] %vm330_vm0, %v1304_v62 }
 0x31d   : > { %v1796_v42 = vpop.f32.mrb[8].mxu1 }
 0x31e   : > { %1442 = vst.msk [vmem:[%s2509_s7 + $0x48] sm:$0xff] %vm330_vm0, %v1796_v42  ;;  %v1314_v59 = vpop.f32.mrb[9].mxu1 }
 0x31f   : > { %1441 = vst.msk [vmem:[%s2509_s7 + $0x40] sm:$0xff] %vm330_vm0, %v1314_v59 }
 0x321   : > { %v1799_v7 = vpop.f32.mrb[10].mxu1 }
 0x322   : > { %1444 = vst.msk [vmem:[%s2509_s7 + $0x58] sm:$0xff] %vm330_vm0, %v1799_v7  ;;  %v1324_v30 = vpop.f32.mrb[11].mxu1 }
 0x323   : > { %1443 = vst.msk [vmem:[%s2509_s7 + $0x50] sm:$0xff] %vm330_vm0, %v1324_v30 }
 0x325   : > { %v1802_v1 = vpop.f32.mrb[12].mxu1 }
 0x326   : > { %1446 = vst.msk [vmem:[%s2509_s7 + $0x68] sm:$0xff] %vm330_vm0, %v1802_v1  ;;  %v1334_v48 = vpop.f32.mrb[13].mxu1 }
 0x327   : > { %1445 = vst.msk [vmem:[%s2509_s7 + $0x60] sm:$0xff] %vm330_vm0, %v1334_v48 }
 0x329   : > { %v1805_v37 = vpop.f32.mrb[14].mxu1 }
 0x32a   : > { %1448 = vst.msk [vmem:[%s2509_s7 + $0x78] sm:$0xff] %vm330_vm0, %v1805_v37  ;;  %v1344_v45 = vpop.f32.mrb[15].mxu1 }
 0x32b   : > { %1447 = vst.msk [vmem:[%s2509_s7 + $0x70] sm:$0xff] %vm330_vm0, %v1344_v45 }
 0x32d   : > { %v1808_v38 = vpop.f32.mrb[16].mxu1 }
 0x32e   : > { %1450 = vst.msk [vmem:[%s2509_s7 + $0x88] sm:$0xff] %vm330_vm0, %v1808_v38  ;;  %v1354_v11 = vpop.f32.mrb[17].mxu1 }
 0x32f   : > { %1449 = vst.msk [vmem:[%s2509_s7 + $0x80] sm:$0xff] %vm330_vm0, %v1354_v11 }
 0x331   : > { %v1811_v39 = vpop.f32.mrb[18].mxu1 }
 0x332   : > { %1452 = vst.msk [vmem:[%s2509_s7 + $0x98] sm:$0xff] %vm330_vm0, %v1811_v39  ;;  %v1364_v9 = vpop.f32.mrb[19].mxu1 }
 0x333   : > { %1451 = vst.msk [vmem:[%s2509_s7 + $0x90] sm:$0xff] %vm330_vm0, %v1364_v9 }
 0x335   : > { %v1814_v8 = vpop.f32.mrb[20].mxu1 }
 0x336   : > { %1454 = vst.msk [vmem:[%s2509_s7 + $0xa8] sm:$0xff] %vm330_vm0, %v1814_v8  ;;  %v1374_v56 = vpop.f32.mrb[21].mxu1 }
 0x337   : > { %1453 = vst.msk [vmem:[%s2509_s7 + $0xa0] sm:$0xff] %vm330_vm0, %v1374_v56 }
 0x339   : > { %v1817_v58 = vpop.f32.mrb[22].mxu1 }
 0x33a   : > { %1456 = vst.msk [vmem:[%s2509_s7 + $0xb8] sm:$0xff] %vm330_vm0, %v1817_v58  ;;  %v1384_v15 = vpop.f32.mrb[23].mxu1 }
 0x33b   : > { %1455 = vst.msk [vmem:[%s2509_s7 + $0xb0] sm:$0xff] %vm330_vm0, %v1384_v15 }
 0x33d   : > { %v1820_v49 = vpop.f32.mrb[24].mxu1 }
 0x33e   : > { %1458 = vst.msk [vmem:[%s2509_s7 + $0xc8] sm:$0xff] %vm330_vm0, %v1820_v49  ;;  %v1394_v46 = vpop.f32.mrb[25].mxu1 }
 0x33f   : > { %1457 = vst.msk [vmem:[%s2509_s7 + $0xc0] sm:$0xff] %vm330_vm0, %v1394_v46 }
 0x341   : > { %v1823_v12 = vpop.f32.mrb[26].mxu1 }
 0x342   : > { %1460 = vst.msk [vmem:[%s2509_s7 + $0xd8] sm:$0xff] %vm330_vm0, %v1823_v12  ;;  %v1404_v52 = vpop.f32.mrb[27].mxu1 }
 0x343   : > { %1459 = vst.msk [vmem:[%s2509_s7 + $0xd0] sm:$0xff] %vm330_vm0, %v1404_v52 }
 0x345   : > { %v1826_v3 = vpop.f32.mrb[28].mxu1 }
 0x346   : > { %1462 = vst.msk [vmem:[%s2509_s7 + $0xe8] sm:$0xff] %vm330_vm0, %v1826_v3  ;;  %v1414_v22 = vpop.f32.mrb[29].mxu1 }
 0x347   : > { %1461 = vst.msk [vmem:[%s2509_s7 + $0xe0] sm:$0xff] %vm330_vm0, %v1414_v22 }
 0x349   : > { %v1829_v36 = vpop.f32.mrb[30].mxu1 }
 0x34a   : > { %1464 = vst.msk [vmem:[%s2509_s7 + $0xf8] sm:$0xff] %vm330_vm0, %v1829_v36  ;;  %v1424_v17 = vpop.f32.mrb[31].mxu1 }
 0x34b   : > { %1463 = vst.msk [vmem:[%s2509_s7 + $0xf0] sm:$0xff] %vm330_vm0, %v1424_v17 }
 0x34c PF: > { %s14_s15 = sadd.s32 1, %s1992_s15  }
 0x34d   : > { %p11_p4 = scmp.ge.s32.totalorder %s14_s15, 4  }
 0x34f   :  { %13 = sbr.rel (!%p11_p4) target bundleno = 1 (0x1), region = 75 }

</bundles_post_ra>
